<compile_context>
chip_gen: v6e
topology: v6e:2x2x1
jax: 0.10.0
libtpu: 0.0.40
codegen_flags: <defaults>
</compile_context>

<pallas_src>
import functools
import math

import numpy as np
import jax
import jax.numpy as jnp
from jax import lax
from jax.experimental import pallas as pl
from jax.experimental.pallas import tpu as pltpu


# ---------------------------------------------------------------------------
# Per-lane constants (computed once per shape, host-side, in float32 like torch)
# ---------------------------------------------------------------------------
@functools.lru_cache(maxsize=None)
def _pe_lane_consts(d_model: int, fold: int) -> np.ndarray:
    """(3, fold*d_model) f32: [div_term per column, folded-row offset, parity]."""
    lane = np.arange(fold * d_model, dtype=np.int64)
    j = lane % d_model                       # original column index
    roff = lane // d_model                   # extra sequence rows folded into lanes
    k2 = (2 * (j // 2)).astype(np.float32)   # 2 * (j // 2), as in the torch module
    div = np.exp(k2 * np.float32(-math.log(10000.0) / d_model)).astype(np.float32)
    odd = (j % 2).astype(np.float32)
    return np.stack([div, roff.astype(np.float32), odd]).astype(np.float32)


def _round_up(x: int, m: int) -> int:
    return (x + m - 1) // m * m


def _pick_tile(n_rows: int, row_bytes: int, target_bytes: int = 2 << 20) -> int:
    """Rows per block: multiple of 8 (or full extent), ~2 MiB per block, and at least
    two grid steps when possible so v7x's two TensorCores both get work."""
    if n_rows <= 8:
        return n_rows
    tile = max(8, (target_bytes // max(row_bytes, 1)) // 8 * 8)
    half = _round_up((n_rows + 1) // 2, 8)
    return max(8, min(tile, half))


# ---------------------------------------------------------------------------
# Table-generation kernel
# ---------------------------------------------------------------------------
def _pe_kernel(consts_ref, o_ref, *, fold: int):
    # consts_ref: (3, d_lane) f32   o_ref: (tile_s, d_lane)
    tile_s = o_ref.shape[0]
    base = pl.program_id(0) * tile_s
    row = (base + lax.broadcasted_iota(jnp.int32, (tile_s, 1), 0)).astype(jnp.float32)

    div = consts_ref[0:1, :]
    if fold == 1:
        angle = row * div                                   # single rounding, == torch
    else:
        # Sequence position = block_row * fold + lane_row_offset (exact integer in f32),
        # then one rounding in the multiply -- still bit-matches the reference.
        pos = row * jnp.float32(fold) + consts_ref[1:2, :]
        angle = pos * div

    odd = consts_ref[2:3, :] > 0.5
    o_ref[...] = jnp.where(odd, jnp.cos(angle), jnp.sin(angle)).astype(o_ref.dtype)


@functools.lru_cache(maxsize=None)
def _pe_table(seq_len: int, d_model: int, dtype_name: str = "float32") -> jax.Array:
    """(seq_len, d_model) sin/cos table generated by the Pallas kernel (memoized)."""
    dtype = np.dtype(dtype_name)
    fold = max(1, 128 // d_model) if d_model < 128 else 1   # lane-dense repack factor
    d_lane = fold * d_model
    rows = -(-seq_len // fold)                               # cdiv

    consts = jnp.asarray(_pe_lane_consts(d_model, fold))
    tile_s = _pick_tile(rows, d_lane * dtype.itemsize)
    grid = (pl.cdiv(rows, tile_s),)

    table = pl.pallas_call(
        functools.partial(_pe_kernel, fold=fold),
        out_shape=jax.ShapeDtypeStruct((rows, d_lane), dtype),
        grid=grid,
        in_specs=[pl.BlockSpec((3, d_lane), lambda i: (0, 0))],
        out_specs=pl.BlockSpec((tile_s, d_lane), lambda i: (i, 0)),
        compiler_params=pltpu.CompilerParams(dimension_semantics=("parallel",)),
    )(consts)

    if fold > 1:
        table = table.reshape(rows * fold, d_model)
    return table[:seq_len]


def positional_encoding(x: jax.Array, max_len: int = 5000, dtype=jnp.float32) -> jax.Array:
    """Equivalent of PositionalEncoding(d_model, max_len)(x) -> (1, seq_len, d_model)."""
    _, seq_len, d_model = x.shape
    assert seq_len <= max_len, "seq_len must be <= max_len"
    assert d_model % 2 == 0, "d_model must be even (same constraint as the PyTorch module)"
    return _pe_table(seq_len, d_model, np.dtype(dtype).name)[None, :, :]


# ---------------------------------------------------------------------------
# Fused x + pe kernel (recommended steady-state entry point: no HBM table re-read)
# ---------------------------------------------------------------------------
def _add_pe_kernel(consts_ref, x_ref, o_ref):
    # consts_ref: (3, d) f32   x_ref / o_ref: (batch, tile_s, d)
    tile_s = x_ref.shape[1]
    base = pl.program_id(0) * tile_s
    pos = (base + lax.broadcasted_iota(jnp.int32, (tile_s, 1), 0)).astype(jnp.float32)
    angle = pos * consts_ref[0:1, :]
    odd = consts_ref[2:3, :] > 0.5
    pe = jnp.where(odd, jnp.cos(angle), jnp.sin(angle))          # (tile_s, d)
    o_ref[...] = (x_ref[...].astype(jnp.float32) + pe[None, :, :]).astype(o_ref.dtype)


def add_positional_encoding(x: jax.Array, max_len: int = 5000) -> jax.Array:
    """Fused x + PositionalEncoding(...)(x); the PE math hides under the x read/write."""
    b, s, d = x.shape
    assert s <= max_len and d % 2 == 0
    consts = jnp.asarray(_pe_lane_consts(d, 1))
    tile_s = _pick_tile(s, b * d * x.dtype.itemsize)
    grid = (pl.cdiv(s, tile_s),)
    return pl.pallas_call(
        _add_pe_kernel,
        out_shape=jax.ShapeDtypeStruct(x.shape, x.dtype),
        grid=grid,
        in_specs=[pl.BlockSpec((3, d), lambda i: (0, 0)),
                  pl.BlockSpec((b, tile_s, d), lambda i: (0, i, 0))],
        out_specs=pl.BlockSpec((b, tile_s, d), lambda i: (0, i, 0)),
        compiler_params=pltpu.CompilerParams(dimension_semantics=("parallel",)),
    )(consts, x)


# ---------------------------------------------------------------------------
# Reference + self-test
# ---------------------------------------------------------------------------
def _reference_pe(seq_len: int, d_model: int) -> jnp.ndarray:
    position = jnp.arange(0, seq_len, dtype=jnp.float32)[:, None]
    div_term = jnp.exp(
        jnp.arange(0, d_model, 2, dtype=jnp.float32) * (-(math.log(10000.0) / d_model))
    )
    pe = jnp.zeros((seq_len, d_model), dtype=jnp.float32)
    pe = pe.at[:, 0::2].set(jnp.sin(position * div_term))
    pe = pe.at[:, 1::2].set(jnp.cos(position * div_term))
    return pe[None]


if __name__ == "__main__":
    key = jax.random.PRNGKey(0)

    # Small case exercising the lane-dense repack (d_model=32 -> fold=4, lanes=128).
    batch, seq_len, d_model = 2, 8, 32
    x = jax.random.normal(key, (batch, seq_len, d_model), dtype=jnp.float32)
    out = jax.block_until_ready(positional_encoding(x))
    ref = _reference_pe(seq_len, d_model)
    assert out.shape == (1, seq_len, d_model), out.shape
    assert jnp.allclose(out, ref, atol=1e-4, rtol=1e-5), "mismatch vs reference (small)"

    # Repack with a padded fold (seq_len not a multiple of fold, non-power-of-2 lanes).
    x1 = jax.random.normal(key, (1, 10, 48), dtype=jnp.float32)
    out1 = jax.block_until_ready(positional_encoding(x1))
    assert out1.shape == (1, 10, 48), out1.shape
    assert jnp.allclose(out1, _reference_pe(10, 48), atol=1e-4, rtol=1e-5), \
        "mismatch vs reference (padded fold)"

    # Multi-block path (grid > 1, full 128 lanes, byte-sized tiles).
    seq_len2, d_model2 = 640, 128
    x2 = jax.random.normal(key, (2, seq_len2, d_model2), dtype=jnp.float32)
    out2 = jax.block_until_ready(positional_encoding(x2))
    ref2 = _reference_pe(seq_len2, d_model2)
    assert out2.shape == (1, seq_len2, d_model2), out2.shape
    assert jnp.allclose(out2, ref2, atol=1e-3, rtol=1e-4), "mismatch vs reference (tiled)"

    # Fused x + pe path.
    fused = jax.block_until_ready(add_positional_encoding(x2))
    assert fused.shape == x2.shape, fused.shape
    assert jnp.allclose(fused, x2 + ref2, atol=1e-3, rtol=1e-4), "mismatch vs reference (fused)"

    print("KERNEL_OK")
</pallas_src>

<mosaic_0001>
module attributes {stable_mosaic.version = 11 : i64} {
  func.func @_pe_kernel(%arg0: i32, %arg1: memref<3x128xf32, #tpu.memory_space<vmem>>, %arg2: memref<2x128xf32, #tpu.memory_space<vmem>>) attributes {dimension_semantics = [#tpu.dimension_semantics<parallel>], iteration_bounds = array<i64: 1>, scalar_prefetch = 0 : i64, scratch_operands = 0 : i64, tpu.core_type = #tpu.core_type<tc>, window_params = [{pipeline_mode = #tpu.pipeline_mode<synchronous>, transform_indices = @transform_0, window_bounds = array<i64: 3, 128>}, {transform_indices = @transform_1, window_bounds = array<i64: 2, 128>}]} {
    %c2_i32 = arith.constant 2 : i32
    %0 = arith.muli %arg0, %c2_i32 : i32
    %1 = tpu.iota {dimensions = array<i32: 0>} : vector<2x1xi32>
    %2 = vector.broadcast %0 : i32 to vector<2x1xi32>
    %3 = arith.addi %2, %1 : vector<2x1xi32>
    %4 = arith.sitofp %3 : vector<2x1xi32> to vector<2x1xf32>
    %c0 = arith.constant 0 : index
    %c0_0 = arith.constant 0 : index
    %5 = vector.load %arg1[%c0, %c0_0] : memref<3x128xf32, #tpu.memory_space<vmem>>, vector<1x128xf32>
    %cst = arith.constant 4.000000e+00 : f32
    %6 = vector.broadcast %cst : f32 to vector<2x1xf32>
    %7 = arith.mulf %4, %6 : vector<2x1xf32>
    %c1 = arith.constant 1 : index
    %c0_1 = arith.constant 0 : index
    %8 = vector.load %arg1[%c1, %c0_1] : memref<3x128xf32, #tpu.memory_space<vmem>>, vector<1x128xf32>
    %9 = vector.broadcast %7 : vector<2x1xf32> to vector<2x128xf32>
    %10 = vector.broadcast %8 : vector<1x128xf32> to vector<2x128xf32>
    %11 = arith.addf %9, %10 : vector<2x128xf32>
    %12 = vector.broadcast %5 : vector<1x128xf32> to vector<2x128xf32>
    %13 = arith.mulf %11, %12 : vector<2x128xf32>
    %c2 = arith.constant 2 : index
    %c0_2 = arith.constant 0 : index
    %14 = vector.load %arg1[%c2, %c0_2] : memref<3x128xf32, #tpu.memory_space<vmem>>, vector<1x128xf32>
    %cst_3 = arith.constant 5.000000e-01 : f32
    %15 = vector.broadcast %cst_3 : f32 to vector<1x128xf32>
    %16 = arith.cmpf ogt, %14, %15 : vector<1x128xf32>
    %17 = math.cos %13 : vector<2x128xf32>
    %18 = math.sin %13 : vector<2x128xf32>
    %19 = vector.shape_cast %16 : vector<1x128xi1> to vector<1x128xi1>
    %20 = vector.broadcast %19 : vector<1x128xi1> to vector<2x128xi1>
    %21 = arith.select %20, %17, %18 : vector<2x128xi1>, vector<2x128xf32>
    %c0_4 = arith.constant 0 : index
    %c0_5 = arith.constant 0 : index
    %22 = vector.load %arg2[%c0_4, %c0_5] : memref<2x128xf32, #tpu.memory_space<vmem>>, vector<2x128xf32>
    tpu.vector_store %arg2[%c0_4, %c0_5], %21 {strides = array<i32>} : memref<2x128xf32, #tpu.memory_space<vmem>>, vector<2x128xf32>,
    return
  }
  func.func @transform_0(%arg0: i32) -> (i32, i32) {
    %c0_i32 = arith.constant 0 : i32
    %c0_i32_0 = arith.constant 0 : i32
    %c0_i32_1 = arith.constant 0 : i32
    return %c0_i32, %c0_i32_0 : i32, i32
  }
  func.func @transform_1(%arg0: i32) -> (i32, i32) {
    %c0_i32 = arith.constant 0 : i32
    %c0_i32_0 = arith.constant 0 : i32
    return %arg0, %c0_i32 : i32, i32
  }
}

</mosaic_0001>

<bundles_post_ra>
// kernel: tpu_custom_call.1
= control target key start
LH: loop header
LB: loop body
LE: loop exit
PB: predicated region body
PF: predicated region fallthrough
CT: control target
= control target key end

     0   :  { %6 = vsyncpa [#allocation3], 0  ;;  %s393_s0 = inlined_call_operand.hbm [shape: f32[3,128], index: 0, kind: input, shape index: {}]   ;;  %s394_s1 = inlined_call_operand.hbm [shape: f32[2,128], index: 1, kind: output, shape index: {}]  }
   0x1   :  { %7 = vsyncpa [#allocation4], 0  ;;  %s343_s6 = smov [#allocation2]  }
   0x2   :  { %s14_s7 = sshll.u32 %s343_s6, 4  ;;  %s15_s7 = int_to_ptr.vmem [resolvable:$true] %s14_s7 }
   0x3   :  { %s307_s8 = scalar_lea.vmem %s15_s7, 64  ;;  %p312_p1 = scmp.lt.s32.totalorder %s15_s7, %s15_s7 }
   0x4   :  { %p308_p0 = scmp.ne.s32.totalorder %s15_s7, %s307_s8  ;;  %p313_p2 = scmp.lt.s32.totalorder %s307_s8, %s307_s8 }
   0x6   :  { %p314_p3 = por %p313_p2, %p312_p1 }
   0x8   :  { %p315_p4 = pnand %p314_p3, %p308_p0 }
   0xa   :  { %318 = shalt.err (!%p315_p4)
}
   0xb   :  { %17 = dma.hbm_to_vmem [thread:$0]  %s393_s0, 64, %s15_s7, [#allocation3]  }
   0xc   :  { %339 = dma.done.wait [#allocation3], 64  }
   0xd   :  { %340 = vsyncadd [#allocation3], 4294967232  ;;  %v22_v0 = vlaneseq  ;;  %v273_v4 = vld [vmem:[#allocation2] ss:$0 sm:$0xff]  ;;  %v272_v5 = vld [vmem:[#allocation2 + $0x1] ss:$0 sm:$0xff] }
   0xe   :  { %v344_v19 = vmov 683565275   ;;  %v345_v21 = vmov 2475754826   ;;  %v346_v23 = vmov 2131351028  }
   0xf   :  { %v365_v1 = vshrl.u32 %v22_v0, 7  ;;  %v347_v25 = vmov 2102212464   ;;  %v348_v27 = vmov 920167782   ;;  %s351_s0 = smov [#allocation5]  }
  0x10   :  { %v349_v34 = vmov 1326507024   ;;  %s263_s11 = sshll.u32 %s351_s0, 4  ;;  %s264_s11 = int_to_ptr.vmem [resolvable:$true] %s263_s11 }
  0x11   :  { %v26_v2 = vcvt.s32.f32 %v365_v1  ;;  %s319_s12 = scalar_lea.vmem %s264_s11, 32  ;;  %p324_p6 = scmp.lt.s32.totalorder %s264_s11, %s264_s11 }
  0x12   :  { %p320_p5 = scmp.ne.s32.totalorder %s264_s11, %s319_s12  ;;  %p325_p7 = scmp.lt.s32.totalorder %s319_s12, %s319_s12 }
  0x13   :  { %v28_v3 = vmul.f32 4.0, %v26_v2 }
  0x14   :  { %p326_p8 = por %p325_p7, %p324_p6 }
  0x15   :  { %v34_v6 = vadd.f32 %v272_v5, %v28_v3 }
  0x16   :  { %p327_p9 = pnand %p326_p8, %p320_p5 }
  0x17   :  { %v368_v7 = vmul.f32 %v273_v4, %v34_v6 }
  0x19   :  { %v45_v8 = vand.u32 2139095040, %v368_v7  ;;  %v42_v10 = vand.u32 2147483647, %v368_v7  ;;  %vm44_vm7 = vcmp.lt.s32.totalorder %v368_v7, 0 }
  0x1b   :  { %v46_v9 = vshrl.u32 %v45_v8, 23  ;;  %v49_v13 = vand.u32 8388607, %v42_v10  ;;  %vm43_vm8 = vcmp.le.f32.partialorder %v42_v10, 0.7853982 }
  0x1d   :  { %v274_v11 = vadd.s32 4294967169, %v46_v9  ;;  %v50_v16 = vor.u32 8388608, %v49_v13 }
  0x1f   :  { %v52_v12 = vadd.s32 1, %v274_v11  ;;  %v90_v36 = vshll.u32 %v50_v16, 8 }
  0x21   :  { %vm53_vm0 = vcmp.gt.s32.totalorder %v52_v12, 0 }
  0x22   :  { %v54_v14 = vsel %vm53_vm0, %v52_v12, 0  ;;  %vm134_vm0 = vweird.f32 %v368_v7 }
  0x23   :  { %v56_v15 = vand.u32 31, %v54_v14  ;;  %v55_v17 = vshrl.u32 %v54_v14, 5 }
  0x25   :  { %v57_v18 = vsub.s32 32, %v56_v15  ;;  %v59_v20 = vshll.u32 %v344_v19, %v56_v15  ;;  %v62_v22 = vshll.u32 %v345_v21, %v56_v15  ;;  %v65_v24 = vshll.u32 %v346_v23, %v56_v15 }
  0x26   :  { %v68_v26 = vshll.u32 %v347_v25, %v56_v15  ;;  %v71_v28 = vshll.u32 %v348_v27, %v56_v15  ;;  %vm74_vm1 = vcmp.lt.s32.totalorder %v55_v17, 1  ;;  %vm77_vm2 = vcmp.lt.s32.totalorder %v55_v17, 4 }
  0x27   :  { %v58_v29 = vshrl.u32 %v344_v19, %v57_v18  ;;  %v60_v30 = vshrl.u32 %v345_v21, %v57_v18  ;;  %v63_v31 = vshrl.u32 %v346_v23, %v57_v18  ;;  %v66_v32 = vshrl.u32 %v347_v25, %v57_v18 }
  0x28   :  { %v69_v33 = vshrl.u32 %v348_v27, %v57_v18  ;;  %v72_v35 = vshrl.u32 %v349_v34, %v57_v18  ;;  %vm75_vm3 = vcmp.lt.s32.totalorder %v55_v17, 2  ;;  %vm76_vm4 = vcmp.lt.s32.totalorder %v55_v17, 3 }
  0x29   :  { %v61_v37 = vor.u32 %v60_v30, %v59_v20  ;;  %v64_v38 = vor.u32 %v63_v31, %v62_v22  ;;  %v67_v39 = vor.u32 %v66_v32, %v65_v24  ;;  %v252_v32 = vsub.s32 0, %v365_v1 }
  0x2a   :  { %v70_v40 = vor.u32 %v69_v33, %v68_v26  ;;  %v73_v41 = vor.u32 %v72_v35, %v71_v28  ;;  %v40_v28 = vld [vmem:[#allocation2 + $0x2] sm:$0x1]  ;;  %v350_v33 = vmov 0  }
  0x2b   :  { %v78_v42 = vsel %vm74_vm1, %v58_v29, %v61_v37  ;;  %v79_v43 = vsel %vm77_vm2, %v67_v39, 2102212464  ;;  %v82_v44 = vsel %vm74_vm1, %v61_v37, %v64_v38  ;;  %v86_v45 = vsel %vm74_vm1, %v64_v38, %v67_v39 }
  0x2c   :  { %v80_v46 = vsel %vm76_vm4, %v64_v38, %v79_v43  ;;  %v83_v47 = vsel %vm77_vm2, %v70_v40, 920167782  ;;  %v87_v48 = vsel %vm77_vm2, %v73_v41, 1326507024  ;;  %vm41_vm9 = vcmp.gt.f32.partialorder %v40_v28, 0.5 }
  0x2d   :  { %v84_v49 = vsel %vm76_vm4, %v67_v39, %v83_v47  ;;  %v88_v50 = vsel %vm76_vm4, %v70_v40, %v87_v48  ;;  %v81_v51 = vsel %vm75_vm3, %v78_v42, %v80_v46  ;;  %v249_v34 = vsel %vm41_vm9, 1, %v350_v33 }
  0x2e   :  { %v85_v52 = vsel %vm75_vm3, %v82_v44, %v84_v49  ;;  %v89_v53 = vsel %vm75_vm3, %v86_v45, %v88_v50  ;;  %v97_v58 = vmul.u32 %v90_v36, %v81_v51  ;;  %v253_v10 = vrot.slane %v249_v34, %v252_v32 }
  0x2f   :  { %v374_v54 = vmul.u32.u64.low %v90_v36, %v89_v53  ;;  %v375_v55 = vmul.u32.u64.high %v90_v36, %v89_v53, %v374_v54  ;;  %v377_v56 = vmul.u32.u64.low %v90_v36, %v85_v52  ;;  %v378_v57 = vmul.u32.u64.high %v90_v36, %v85_v52, %v377_v56 }
  0x30   :  { %vm254_vm1 = vcmp.eq.s32.totalorder %v253_v10, 1 }
  0x31   :  { %vm99_vm5 = vc.u32 %v375_v55, %v377_v56  ;;  %v100_v59 = vadd.s32 1, %v378_v57  ;;  %v98_v8 = vadd.s32 %v377_v56, %v375_v55 }
  0x33   :  { %v101_v60 = vsel %vm99_vm5, %v100_v59, %v378_v57 }
  0x34   :  { %v102_v61 = vadd.s32 %v101_v60, %v97_v58 }
  0x36   :  { %v103_v62 = vadd.s32 536870912, %v102_v61 }
  0x38   :  { %v104_v63 = vshrl.u32 %v103_v62, 30 }
  0x3a   :  { %v105_v0 = vshll.u32 %v104_v63, 30  ;;  %v128_v22 = vsub.s32 4, %v104_v63 }
  0x3c   :  { %v106_v2 = vsub.s32 %v102_v61, %v105_v0  ;;  %v129_v25 = vsel %vm44_vm7, %v128_v22, %v104_v63 }
  0x3d   :  { %v131_v27 = vsel %vm43_vm8, 0, %v129_v25 }
  0x3e   :  { %v108_v3 = vsub.s32 0, %v106_v2  ;;  %v238_v29 = vadd.s32 3, %v131_v27  ;;  %v135_v30 = vand.u32 3, %v131_v27 }
  0x40   :  { %v275_v4 = vmin.u32 %v108_v3, %v106_v2  ;;  %v239_v31 = vand.u32 3, %v238_v29  ;;  %vm140_vm10 = vcmp.eq.s32.totalorder %v135_v30, 2  ;;  %vm137_vm12 = vcmp.eq.s32.totalorder %v135_v30, 0 }
  0x41   :  { %vm136_vm14 = vcmp.lt.s32.totalorder %v135_v30, 2 }
  0x42   :  { %v110_v5 = vclz %v275_v4  ;;  %vm244_vm11 = vcmp.eq.s32.totalorder %v239_v31, 2  ;;  %vm241_vm13 = vcmp.eq.s32.totalorder %v239_v31, 0  ;;  %vm240_vm15 = vcmp.lt.s32.totalorder %v239_v31, 2 }
  0x44   :  { %v276_v6 = vadd.s32 4294967294, %v110_v5 }
  0x46   :  { %vm277_vm6 = vcmp.lt.s32.totalorder %v276_v6, 0 }
  0x47   :  { %v113_v9 = vsel %vm277_vm6, 0, %v276_v6 }
  0x48   :  { %v114_v11 = vsub.s32 32, %v113_v9  ;;  %v115_v12 = vshll.u32 %v106_v2, %v113_v9  ;;  %v118_v13 = vsub.s32 4294967266, %v113_v9 }
  0x4a   :  { %v116_v14 = vshrl.u32 %v98_v8, %v114_v11  ;;  %v119_v15 = vadd.s32 127, %v118_v13 }
  0x4c   :  { %v117_v16 = vor.u32 %v116_v14, %v115_v12  ;;  %v120_v17 = vshll.u32 %v119_v15, 23 }
  0x4e   :  { %v121_v18 = vor.u32 4788187, %v120_v17  ;;  %v124_v19 = vcvt.s32.f32 %v117_v16 }
  0x50   :  { %v122_v20 = vand.u32 2147483647, %v121_v18 }
  0x52   :  { %v125_v21 = vmul.f32 %v124_v19, %v122_v20 }
  0x54   :  { %v126_v23 = vxor.u32 2147483648, %v125_v21 }
  0x56   :  { %v127_v24 = vsel %vm44_vm7, %v126_v23, %v125_v21 }
  0x57   :  { %v130_v26 = vsel %vm43_vm8, %v368_v7, %v127_v24 }
  0x58   :  { %295 = vcosq.f32 %v130_v26 }
  0x59   :  { %297 = vsinq.f32 %v130_v26 }
  0x65   :  { %v296_v35 = vpop.eup %295 }
  0x66   :  { %v298_v36 = vpop.eup %297  ;;  %v141_v37 = vxor.u32 2147483648, %v296_v35 }
  0x67   :  { %v138_v38 = vxor.u32 2147483648, %v298_v36 }
  0x68   :  { %v142_v39 = vsel %vm140_vm10, %v141_v37, %v298_v36  ;;  %v246_v40 = vsel %vm244_vm11, %v141_v37, %v298_v36 }
  0x69   :  { %v139_v1 = vsel %vm137_vm12, %v296_v35, %v138_v38  ;;  %v243_v41 = vsel %vm241_vm13, %v296_v35, %v138_v38 }
  0x6a   :  { %v143_v42 = vsel %vm136_vm14, %v139_v1, %v142_v39  ;;  %v247_v43 = vsel %vm240_vm15, %v243_v41, %v246_v40 }
  0x6b   :  { %v144_v44 = vsel %vm134_vm0, nan, %v143_v42  ;;  %v248_v45 = vsel %vm134_vm0, nan, %v247_v43 }
  0x6c   :  { %v255_v46 = vsel %vm254_vm1, %v144_v44, %v248_v45 }
  0x6d   :  { %256 = vst [vmem:[#allocation5] sm:$0x3] %v255_v46 }
  0x6e   :  { %330 = shalt.err (!%p327_p9)
}
  0x6f   :  { %266 = dma.vmem_to_hbm [thread:$0]  %s264_s11, 32, %s394_s1, [#allocation4]  }
  0x70   :  { %341 = dma.done.wait [#allocation4], 32  }
  0x71   :  { %342 = vsyncadd [#allocation4], 4294967264 }
  0x72   :  { %270 = vsyncpa [#allocation3], 1 }
  0x73   :  { %271 = vsyncpa [#allocation4], 1 }

</bundles_post_ra>
